<compile_context>
chip_gen: v7x
topology: tpu7x:2x2x1
jax: 0.10.0
libtpu: 0.0.40
codegen_flags: <defaults>
</compile_context>

<pallas_src>
import jax
import jax.numpy as jnp
from jax import lax
from jax.experimental import pallas as pl
from jax.experimental.pallas import tpu as pltpu


EPS = 1e-6
LANES = 128


# ----------------------------- kernels --------------------------------------


def _standard_kernel(x_ref, alpha_ref, bias_ref, o_ref):
    """LayerNorm + residual over a (tile_rows, D) block; reduction along lanes."""
    x = x_ref[...].astype(jnp.float32)
    d = x.shape[-1]
    mu = jnp.sum(x, axis=-1, keepdims=True) * (1.0 / d)
    xc = x - mu
    # Two-pass unbiased variance (matches torch.Tensor.std(), ddof=1).
    var = jnp.sum(xc * xc, axis=-1, keepdims=True) * (1.0 / (d - 1))
    inv = pl.reciprocal(jnp.sqrt(var) + EPS, approx=False)
    alpha = alpha_ref[...].astype(jnp.float32)
    bias = bias_ref[...].astype(jnp.float32)
    y = xc * (alpha * inv) + bias
    # sublayer = identity, eval-mode dropout = identity => residual add of x.
    o_ref[...] = y.astype(o_ref.dtype) + x_ref[...]


def _make_packed_kernel(d: int):
    """LayerNorm + residual where k = 128 // d logical rows are packed per 128 lanes.

    Per-segment sums are computed on the MXU with a block-diagonal ones matrix so the
    block stays fully lane-dense (unmasked loads/stores); XLU/VPU stay nearly idle.
    """
    inv_d = 1.0 / d
    inv_dm1 = 1.0 / (d - 1)

    def kernel(x_ref, alpha_ref, bias_ref, seg_ref, o_ref):
        x = x_ref[...].astype(jnp.float32)
        seg = seg_ref[...]  # (128, 128) f32, block-diagonal ones
        # Segment sums broadcast within each d-wide lane segment.
        s1 = jnp.dot(x, seg, preferred_element_type=jnp.float32,
                     precision=lax.Precision.HIGHEST)
        mu = s1 * inv_d
        xc = x - mu
        ss = jnp.dot(xc * xc, seg, preferred_element_type=jnp.float32,
                     precision=lax.Precision.HIGHEST)
        inv = pl.reciprocal(jnp.sqrt(ss * inv_dm1) + EPS, approx=False)
        alpha = alpha_ref[...].astype(jnp.float32)
        bias = bias_ref[...].astype(jnp.float32)
        y = xc * (alpha * inv) + bias
        o_ref[...] = y.astype(o_ref.dtype) + x_ref[...]

    return kernel


# ----------------------------- tiling helpers --------------------------------


def _vmem_limit_bytes() -> int:
    """Generation-aware scoped-VMEM budget (v5e/v6e: 128 MiB phys; v7x: 64 MiB/TC)."""
    try:
        phys = getattr(pltpu.get_tpu_info(), "vmem_capacity_bytes", 0)
    except Exception:  # pragma: no cover - conservative fallback
        phys = 0
    if phys >= 128 * 1024 * 1024:
        return 96 * 1024 * 1024          # v5e / v6e: plenty of headroom
    return 48 * 1024 * 1024              # v7x (64 MiB / TC) or unknown: conservative


def _pick_tile_rows(rows: int, width: int, bytes_per_elem: int, budget: int) -> int:
    """Row tile sized purely by bytes; multiple of 8 unless it is the full extent."""
    t = max(8, (budget // max(1, width * bytes_per_elem)) // 8 * 8)
    if t < rows:
        return t                          # multiple of 8, grid >= 2
    if rows > 8:
        # Fits in one tile: still split into >=2 grid steps so both v7x TensorCores
        # get work on this bandwidth-bound kernel.
        return max(8, ((rows + 1) // 2 + 7) // 8 * 8)
    return rows                           # tiny problem: single full-extent block


# ----------------------------- wrapper ---------------------------------------


def residual_connection_forward(x, alpha, bias):
    """Pallas implementation of ResidualConnection.forward with identity sublayer.

    Args:
      x:     [B, S, D] input embeddings.
      alpha: [D] LayerNorm scale.
      bias:  [D] LayerNorm shift.
    Returns:
      [B, S, D] = LayerNorm(x) + x   (sublayer / eval dropout are identity).
    """
    b, s, d = x.shape
    assert d >= 2, "unbiased std (ddof=1) requires at least 2 features"
    rows = b * s
    dtype = x.dtype
    itemsize = jnp.dtype(dtype).itemsize
    vmem_limit = _vmem_limit_bytes()
    # Per-element VMEM model: double-buffered in + out at input dtype (4*itemsize)
    # plus ~3 f32 temporaries from the .astype(f32) upcast / centered / scaled copies.
    bytes_per_elem = 4 * itemsize + 12
    tile_budget = int(vmem_limit * 0.85)

    x2d = x.reshape(rows, d)
    alpha2d = alpha.reshape(1, d)
    bias2d = bias.reshape(1, d)

    pack = (d < LANES) and (LANES % d == 0)
    if pack:
        # ---- lane-dense packed path: k logical rows per 128-lane physical row ----
        k = LANES // d
        w = LANES
        rp = max(pl.cdiv(rows, k), 8)     # packed rows; >=8 keeps (8,128)/MXU shapes clean
        rows_pad = rp * k
        if rows_pad != rows:
            # Zero padding rows produce finite garbage stats (y == bias) and are
            # sliced off below; masked writeback keeps valid rows untouched.
            x2d = jnp.concatenate(
                [x2d, jnp.zeros((rows_pad - rows, d), dtype)], axis=0)
        xk = x2d.reshape(rp, w)
        alpha_k = jnp.tile(alpha2d, (1, k))
        bias_k = jnp.tile(bias2d, (1, k))
        lane_seg = jnp.arange(w) // d
        seg = (lane_seg[:, None] == lane_seg[None, :]).astype(jnp.float32)

        tile_rows = _pick_tile_rows(rp, w, bytes_per_elem, tile_budget)
        grid = (pl.cdiv(rp, tile_rows),)
        cost = pl.CostEstimate(
            flops=4 * rp * w * w + 10 * rp * w,
            transcendentals=2 * rp * w,
            bytes_accessed=2 * rp * w * itemsize + (2 * w + w * w) * 4,
        )

        out = pl.pallas_call(
            _make_packed_kernel(d),
            out_shape=jax.ShapeDtypeStruct((rp, w), dtype),
            grid_spec=pltpu.PrefetchScalarGridSpec(
                num_scalar_prefetch=0,
                grid=grid,
                in_specs=[
                    pl.BlockSpec((tile_rows, w), lambda i: (i, 0)),
                    pl.BlockSpec((1, w), lambda i: (0, 0)),
                    pl.BlockSpec((1, w), lambda i: (0, 0)),
                    pl.BlockSpec((w, w), lambda i: (0, 0)),
                ],
                out_specs=pl.BlockSpec((tile_rows, w), lambda i: (i, 0)),
            ),
            compiler_params=pltpu.CompilerParams(
                dimension_semantics=("parallel",),
                vmem_limit_bytes=vmem_limit,
            ),
            cost_estimate=cost,
        )(xk, alpha_k, bias_k, seg)
        out2d = out.reshape(rows_pad, d)[:rows]
    else:
        # ---- standard path: D >= 128 (lane-dense by construction) or 128 % D != 0 ----
        # TODO(synk): if D >= 128 but not a multiple of 128, the final partial lane
        #             group still uses masked stores; production D should be 128-aligned.
        tile_rows = _pick_tile_rows(rows, d, bytes_per_elem, tile_budget)
        grid = (pl.cdiv(rows, tile_rows),)
        cost = pl.CostEstimate(
            flops=12 * rows * d,
            transcendentals=2 * rows,
            bytes_accessed=2 * rows * d * itemsize + 2 * d * itemsize,
        )

        out2d = pl.pallas_call(
            _standard_kernel,
            out_shape=jax.ShapeDtypeStruct((rows, d), dtype),
            grid_spec=pltpu.PrefetchScalarGridSpec(
                num_scalar_prefetch=0,
                grid=grid,
                in_specs=[
                    pl.BlockSpec((tile_rows, d), lambda i: (i, 0)),
                    pl.BlockSpec((1, d), lambda i: (0, 0)),
                    pl.BlockSpec((1, d), lambda i: (0, 0)),
                ],
                out_specs=pl.BlockSpec((tile_rows, d), lambda i: (i, 0)),
            ),
            compiler_params=pltpu.CompilerParams(
                dimension_semantics=("parallel",),
                vmem_limit_bytes=vmem_limit,
            ),
            cost_estimate=cost,
        )(x2d, alpha2d, bias2d)

    return out2d.reshape(b, s, d)


# ----------------------------- reference & test ------------------------------


def _reference(x, alpha, bias):
    mu = jnp.mean(x, axis=-1, keepdims=True)
    sig = jnp.std(x, axis=-1, keepdims=True, ddof=1)    # match torch unbiased std
    y = alpha * (x - mu) / (sig + EPS) + bias
    return y + x                                        # identity sublayer + eval dropout


if __name__ == "__main__":
    key = jax.random.PRNGKey(0)
    k_x, k_a, k_b = jax.random.split(key, 3)

    B, S, D = 2, 8, 32
    x = jax.random.normal(k_x, (B, S, D), dtype=jnp.float32)
    # Non-trivial (but deterministic) parameters to exercise the scale/shift broadcast.
    alpha = 1.0 + 0.1 * jax.random.normal(k_a, (D,), dtype=jnp.float32)
    bias = 0.1 * jax.random.normal(k_b, (D,), dtype=jnp.float32)

    out = jax.block_until_ready(residual_connection_forward(x, alpha, bias))

    ref = _reference(x, alpha, bias)
    assert out.shape == (B, S, D)
    assert jnp.allclose(out, ref, atol=1e-5, rtol=1e-5), "mismatch vs reference"

    print("KERNEL_OK")
</pallas_src>

<mosaic_0001>
module attributes {stable_mosaic.version = 11 : i64} {
  func.func @kernel(%arg0: i32, %arg1: memref<8x128xf32, #tpu.memory_space<vmem>>, %arg2: memref<1x128xf32, #tpu.memory_space<vmem>>, %arg3: memref<1x128xf32, #tpu.memory_space<vmem>>, %arg4: memref<128x128xf32, #tpu.memory_space<vmem>>, %arg5: memref<8x128xf32, #tpu.memory_space<vmem>>) attributes {dimension_semantics = [#tpu.dimension_semantics<parallel>], iteration_bounds = array<i64: 1>, scalar_prefetch = 0 : i64, scratch_operands = 0 : i64, tpu.core_type = #tpu.core_type<tc>, window_params = [{transform_indices = @transform_0, window_bounds = array<i64: 8, 128>}, {pipeline_mode = #tpu.pipeline_mode<synchronous>, transform_indices = @transform_1, window_bounds = array<i64: 1, 128>}, {pipeline_mode = #tpu.pipeline_mode<synchronous>, transform_indices = @transform_2, window_bounds = array<i64: 1, 128>}, {pipeline_mode = #tpu.pipeline_mode<synchronous>, transform_indices = @transform_3, window_bounds = array<i64: 128, 128>}, {transform_indices = @transform_4, window_bounds = array<i64: 8, 128>}]} {
    %c0 = arith.constant 0 : index
    %c0_0 = arith.constant 0 : index
    %0 = vector.load %arg1[%c0, %c0_0] : memref<8x128xf32, #tpu.memory_space<vmem>>, vector<8x128xf32>
    %c0_1 = arith.constant 0 : index
    %c0_2 = arith.constant 0 : index
    %1 = vector.load %arg4[%c0_1, %c0_2] : memref<128x128xf32, #tpu.memory_space<vmem>>, vector<128x128xf32>
    %cst = arith.constant dense<0.000000e+00> : vector<8x128xf32>
    %2 = tpu.matmul %0, %1, %cst {dimension_numbers = #tpu.dot_dimension_numbers<[1], [0], [0], [1], [0, 0, 1, 1], [], []>, precision = #tpu.contract_precision<fp32>} : vector<8x128xf32>, vector<128x128xf32>, vector<8x128xf32> -> vector<8x128xf32>
    %cst_3 = arith.constant 3.125000e-02 : f32
    %3 = vector.broadcast %cst_3 : f32 to vector<8x128xf32>
    %4 = arith.mulf %2, %3 : vector<8x128xf32>
    %5 = arith.subf %0, %4 : vector<8x128xf32>
    %6 = arith.mulf %5, %5 : vector<8x128xf32>
    %cst_4 = arith.constant dense<0.000000e+00> : vector<8x128xf32>
    %7 = tpu.matmul %6, %1, %cst_4 {dimension_numbers = #tpu.dot_dimension_numbers<[1], [0], [0], [1], [0, 0, 1, 1], [], []>, precision = #tpu.contract_precision<fp32>} : vector<8x128xf32>, vector<128x128xf32>, vector<8x128xf32> -> vector<8x128xf32>
    %cst_5 = arith.constant 0.0322580636 : f32
    %8 = vector.broadcast %cst_5 : f32 to vector<8x128xf32>
    %9 = arith.mulf %7, %8 : vector<8x128xf32>
    %10 = math.sqrt %9 : vector<8x128xf32>
    %cst_6 = arith.constant 9.99999997E-7 : f32
    %11 = vector.broadcast %cst_6 : f32 to vector<8x128xf32>
    %12 = arith.addf %10, %11 : vector<8x128xf32>
    %13 = tpu.reciprocal %12 : vector<8x128xf32> -> vector<8x128xf32>
    %c0_7 = arith.constant 0 : index
    %c0_8 = arith.constant 0 : index
    %14 = vector.load %arg2[%c0_7, %c0_8] : memref<1x128xf32, #tpu.memory_space<vmem>>, vector<1x128xf32>
    %c0_9 = arith.constant 0 : index
    %c0_10 = arith.constant 0 : index
    %15 = vector.load %arg3[%c0_9, %c0_10] : memref<1x128xf32, #tpu.memory_space<vmem>>, vector<1x128xf32>
    %16 = vector.broadcast %14 : vector<1x128xf32> to vector<8x128xf32>
    %17 = arith.mulf %16, %13 : vector<8x128xf32>
    %18 = arith.mulf %5, %17 : vector<8x128xf32>
    %19 = vector.broadcast %15 : vector<1x128xf32> to vector<8x128xf32>
    %20 = arith.addf %18, %19 : vector<8x128xf32>
    %c0_11 = arith.constant 0 : index
    %c0_12 = arith.constant 0 : index
    %21 = vector.load %arg1[%c0_11, %c0_12] : memref<8x128xf32, #tpu.memory_space<vmem>>, vector<8x128xf32>
    %22 = arith.addf %20, %21 : vector<8x128xf32>
    %c0_13 = arith.constant 0 : index
    %c0_14 = arith.constant 0 : index
    %23 = vector.load %arg5[%c0_13, %c0_14] : memref<8x128xf32, #tpu.memory_space<vmem>>, vector<8x128xf32>
    tpu.vector_store %arg5[%c0_13, %c0_14], %22 {strides = array<i32>} : memref<8x128xf32, #tpu.memory_space<vmem>>, vector<8x128xf32>,
    return
  }
  func.func @transform_0(%arg0: i32) -> (i32, i32) {
    %c0_i32 = arith.constant 0 : i32
    %c0_i32_0 = arith.constant 0 : i32
    return %arg0, %c0_i32 : i32, i32
  }
  func.func @transform_1(%arg0: i32) -> (i32, i32) {
    %c0_i32 = arith.constant 0 : i32
    %c0_i32_0 = arith.constant 0 : i32
    %c0_i32_1 = arith.constant 0 : i32
    return %c0_i32, %c0_i32_0 : i32, i32
  }
  func.func @transform_2(%arg0: i32) -> (i32, i32) {
    %c0_i32 = arith.constant 0 : i32
    %c0_i32_0 = arith.constant 0 : i32
    %c0_i32_1 = arith.constant 0 : i32
    return %c0_i32, %c0_i32_0 : i32, i32
  }
  func.func @transform_3(%arg0: i32) -> (i32, i32) {
    %c0_i32 = arith.constant 0 : i32
    %c0_i32_0 = arith.constant 0 : i32
    %c0_i32_1 = arith.constant 0 : i32
    return %c0_i32, %c0_i32_0 : i32, i32
  }
  func.func @transform_4(%arg0: i32) -> (i32, i32) {
    %c0_i32 = arith.constant 0 : i32
    %c0_i32_0 = arith.constant 0 : i32
    return %arg0, %c0_i32 : i32, i32
  }
}

</mosaic_0001>

<bundles_post_ra>
// kernel: tpu_custom_call.1
= control target key start
LH: loop header
LB: loop body
LE: loop exit
PB: predicated region body
PF: predicated region fallthrough
CT: control target
= control target key end

     0   :  { %9 = vsyncpa [#allocation3], 0  ;;  %s2883_s0 = inlined_call_operand.hbm [shape: f32[8,128], index: 0, kind: input, shape index: {}]   ;;  %s2884_s1 = inlined_call_operand.vmem [shape: f32[1,128], index: 1, kind: input, shape index: {}]   ;;  %s2885_s2 = inlined_call_operand.vmem [shape: f32[1,128], index: 2, kind: input, shape index: {}]   ;;  %s2886_s3 = inlined_call_operand.hbm [shape: f32[128,128], index: 3, kind: input, shape index: {}]   ;;  %s2887_s4 = inlined_call_operand.hbm [shape: f32[8,128], index: 4, kind: output, shape index: {}]  }
   0x1   :  { %10 = vsyncpa [#allocation6], 0 }
   0x2   :  { %11 = vsyncpa [#allocation4], 0  ;;  %s2409_s15 = smov [#allocation2]   ;;  %s2410_s17 = smov [#allocation5]  }
   0x3   :  { %s18_s16 = sshll.u32 %s2409_s15, 4  ;;  %s31_s18 = sshll.u32 %s2410_s17, 4  ;;  %s19_s16 = int_to_ptr.vmem [resolvable:$true] %s18_s16  ;;  %s2442_s18 = int_to_ptr.vmem [resolvable:$true] %s31_s18 }
   0x4   :  { %s2337_s21 = scalar_lea.hbm %s2883_s0, 128 }
   0x5   :  { %p2338_p0 = scmp.ne.s32.totalorder %s2883_s0, %s2337_s21  ;;  %p2341_p1 = scmp.lt.u32.totalorder %s2337_s21, %s2883_s0 }
   0x7   :  { %p2343_p2 = pnand %p2341_p1, %p2338_p0 }
   0x9   :  { %2346 = shalt.err (!%p2343_p2)
}
   0xa   :  { %s2347_s26 = scalar_lea.vmem %s19_s16, 128  ;;  %p2352_p4 = scmp.lt.s32.totalorder %s19_s16, %s19_s16 }
   0xb   :  { %p2348_p3 = scmp.ne.s32.totalorder %s19_s16, %s2347_s26  ;;  %p2353_p5 = scmp.lt.s32.totalorder %s2347_s26, %s2347_s26 }
   0xd   :  { %p2354_p6 = por %p2353_p5, %p2352_p4 }
   0xf   :  { %p2355_p7 = pnand %p2354_p6, %p2348_p3 }
  0x11   :  { %2358 = shalt.err (!%p2355_p7)
}
  0x12   :  { %21 = dma.hbm_to_vmem [thread:$0]  %s2883_s0, 128, %s19_s16, [#allocation3]  }
  0x13   :  { %s2359_s5 = scalar_lea.hbm %s2886_s3, 2048 }
  0x14   :  { %p2360_p8 = scmp.ne.s32.totalorder %s2886_s3, %s2359_s5  ;;  %p2363_p9 = scmp.lt.u32.totalorder %s2359_s5, %s2886_s3 }
  0x16   :  { %p2365_p10 = pnand %p2363_p9, %p2360_p8 }
  0x18   :  { %2368 = shalt.err (!%p2365_p10)
}
  0x19   :  { %s2369_s10 = scalar_lea.vmem %s2442_s18, 2048  ;;  %p2374_p12 = scmp.lt.s32.totalorder %s2442_s18, %s2442_s18 }
  0x1a   :  { %p2370_p11 = scmp.ne.s32.totalorder %s2442_s18, %s2369_s10  ;;  %p2375_p13 = scmp.lt.s32.totalorder %s2369_s10, %s2369_s10 }
  0x1c   :  { %p2376_p0 = por %p2375_p13, %p2374_p12 }
  0x1e   :  { %p2377_p1 = pnand %p2376_p0, %p2370_p11 }
  0x20   :  { %2380 = shalt.err (!%p2377_p1)
}
  0x21   :  { %s2411_s0 = smov 128   ;;  %s2412_s11 = smov 8  }
  0x22   :  { %37 = dma.hbm_to_vmem [thread:$0]  %s2886_s3, 2048, %s2442_s18, [#allocation6], %s2411_s0, %s2411_s0, %s2412_s11  }
  0x23   :  { %2403 = dma.done.wait [#allocation3], 128  }
  0x24   :  { %2404 = vsyncadd [#allocation3], 4294967168 }
  0x25   :  { %2405 = dma.done.wait [#allocation6], 2048  }
  0x26   :  { %2406 = vsyncadd [#allocation6], 4294965248  ;;  %v2413_v0 = vmov 0.0|0.0   ;;  %vm2414_vm0 = vmmov 0   ;;  %v2415_v1 = vmov 0.0   ;;  %v45_v2 = vld [vmem:[#allocation5] sm:$0xff] }
  0x27   :  { %2017 = vmatprep.subr.bf16.mxu0 %v2413_v0  ;;  %1629 = vmatprep.mubr.msk.f32.mxu0 %vm2414_vm0, %v2415_v1  ;;  %v46_v3 = vld [vmem:[#allocation5 + $0x8] sm:$0xff]  ;;  %v47_v4 = vld [vmem:[#allocation5 + $0x10] sm:$0xff]  ;;  %v62_v5 = vand.u32 4294901760, %v45_v2  ;;  %v48_v7 = vld [vmem:[#allocation5 + $0x18] sm:$0xff]  ;;  %s2416_s17 = smov [#allocation7]  }
  0x28   :  { %2161 = vmatprep.subr.bf16.mxu1 %v2413_v0  ;;  %1839 = vmatprep.mubr.msk.f32.mxu1 %vm2414_vm0, %v2415_v1  ;;  %v65_v6 = vand.u32 4294901760, %v46_v3  ;;  %v68_v8 = vand.u32 4294901760, %v47_v4  ;;  %v71_v9 = vand.u32 4294901760, %v48_v7  ;;  %v49_v10 = vld [vmem:[#allocation5 + $0x20] sm:$0xff]  ;;  %v50_v11 = vld [vmem:[#allocation5 + $0x28] sm:$0xff]  ;;  %v51_v16 = vld [vmem:[#allocation5 + $0x30] sm:$0xff] }
  0x29   :  { %v74_v14 = vand.u32 4294901760, %v49_v10  ;;  %v77_v15 = vand.u32 4294901760, %v50_v11  ;;  %v52_v17 = vld [vmem:[#allocation5 + $0x38] sm:$0xff]  ;;  %v80_v19 = vand.u32 4294901760, %v51_v16  ;;  %v53_v21 = vld [vmem:[#allocation5 + $0x40] sm:$0xff]  ;;  %v54_v23 = vld [vmem:[#allocation5 + $0x48] sm:$0xff]  ;;  %v2501_v34 = vsub.f32 %v45_v2, %v62_v5 }
  0x2a   :  { %v2479_v12 = vpack.c.bf16 %v65_v6, %v62_v5  ;;  %v2482_v13 = vpack.c.bf16 %v71_v9, %v68_v8  ;;  %v83_v20 = vand.u32 4294901760, %v52_v17  ;;  %v2490_v22 = vld [vmem:[#allocation2] sm:$0xff]  ;;  %v55_v24 = vld [vmem:[#allocation5 + $0x50] sm:$0xff]  ;;  %v57_v26 = vld [vmem:[#allocation5 + $0x60] sm:$0xff]  ;;  %v86_v27 = vand.u32 4294901760, %v53_v21  ;;  %s1381_s18 = sshll.u32 %s2416_s17, 4  ;;  %s1382_s18 = int_to_ptr.vmem [resolvable:$true] %s1381_s18 }
  0x2b   :  { %v2488_v18 = vpack.c.bf16 %v77_v15, %v74_v14  ;;  %v56_v25 = vld [vmem:[#allocation5 + $0x58] sm:$0xff]  ;;  %v58_v28 = vld [vmem:[#allocation5 + $0x68] sm:$0xff]  ;;  %v59_v29 = vld [vmem:[#allocation5 + $0x70] sm:$0xff]  ;;  %v2496_v31 = vand.u32 4294901760, %v2490_v22  ;;  %v89_v33 = vand.u32 4294901760, %v54_v23  ;;  %v2503_v35 = vsub.f32 %v46_v3, %v65_v6  ;;  %s2381_s19 = scalar_lea.vmem %s1382_s18, 128  ;;  %p2386_p3 = scmp.lt.s32.totalorder %s1382_s18, %s1382_s18 }
  0x2c   :  { %2019 = vmatpush3.bf16.msra.mxu0 %v2479_v12  ;;  %2163 = vmatpush3.bf16.msra.mxu1 %v2479_v12  ;;  %v60_v30 = vld [vmem:[#allocation5 + $0x78] sm:$0xff]  ;;  %v2499_v32 = vpack.c.bf16 %v83_v20, %v80_v19  ;;  %v92_v36 = vand.u32 4294901760, %v55_v24  ;;  %v95_v37 = vand.u32 4294901760, %v56_v25  ;;  %v98_v38 = vand.u32 4294901760, %v57_v26  ;;  %p2382_p2 = scmp.ne.s32.totalorder %s1382_s18, %s2381_s19  ;;  %p2387_p4 = scmp.lt.s32.totalorder %s2381_s19, %s2381_s19 }
  0x2d   :  { %2020 = vmatprep.subr.bf16.mxu0 %v2413_v0  ;;  %2164 = vmatprep.subr.bf16.mxu1 %v2413_v0  ;;  %v101_v39 = vand.u32 4294901760, %v58_v28  ;;  %v104_v40 = vand.u32 4294901760, %v59_v29  ;;  %v107_v41 = vand.u32 4294901760, %v60_v30  ;;  %v2510_v42 = vsub.f32 %v2490_v22, %v2496_v31 }
  0x2e   :  { %v2512_v43 = vsub.f32 %v47_v4, %v68_v8  ;;  %v2515_v44 = vpack.c.bf16 %v89_v33, %v86_v27  ;;  %v155_v45 = vand.u32 4294901760, %v2501_v34  ;;  %v162_v46 = vand.u32 4294901760, %v2503_v35  ;;  %p2388_p5 = por %p2387_p4, %p2386_p3 }
  0x2f   :  { %v2519_v47 = vsub.f32 %v48_v7, %v71_v9  ;;  %v2523_v48 = vsub.f32 %v49_v10, %v74_v14  ;;  %v2526_v49 = vpack.c.bf16 %v95_v37, %v92_v36  ;;  %v2528_v50 = vpack.c.bf16 %v101_v39, %v98_v38 }
  0x30   :  { %2022 = vmatpush3.bf16.msra.mxu0 %v2482_v13  ;;  %2166 = vmatpush3.bf16.msra.mxu1 %v2482_v13  ;;  %v2530_v51 = vpack.c.bf16 %v107_v41, %v104_v40  ;;  %v144_v52 = vand.u32 4294901760, %v2510_v42  ;;  %v169_v53 = vand.u32 4294901760, %v2512_v43  ;;  %v2534_v54 = vsub.f32 %v50_v11, %v77_v15  ;;  %p2389_p6 = pnand %p2388_p5, %p2382_p2 }
  0x31   :  { %2023 = vmatprep.subr.bf16.mxu0 %v2413_v0  ;;  %2167 = vmatprep.subr.bf16.mxu1 %v2413_v0  ;;  %v2536_v55 = vsub.f32 %v51_v16, %v80_v19  ;;  %v156_v56 = vsub.f32 %v2501_v34, %v155_v45  ;;  %v163_v57 = vsub.f32 %v2503_v35, %v162_v46  ;;  %v176_v58 = vand.u32 4294901760, %v2519_v47 }
  0x32   :  { %v2542_v59 = vsub.f32 %v52_v17, %v83_v20  ;;  %v183_v60 = vand.u32 4294901760, %v2523_v48  ;;  %v2547_v61 = vsub.f32 %v53_v21, %v86_v27  ;;  %v2549_v62 = vsub.f32 %v54_v23, %v89_v33 }
  0x33   :  { %v2551_v63 = vsub.f32 %v55_v24, %v92_v36  ;;  %v2554_v2 = vsub.f32 %v56_v25, %v95_v37  ;;  %v2556_v3 = vsub.f32 %v57_v26, %v98_v38  ;;  %v2558_v4 = vsub.f32 %v58_v28, %v101_v39 }
  0x34   :  { %2025 = vmatpush3.bf16.msra.mxu0 %v2488_v18  ;;  %2169 = vmatpush3.bf16.msra.mxu1 %v2488_v18  ;;  %v2560_v5 = vsub.f32 %v59_v29, %v104_v40  ;;  %v145_v6 = vsub.f32 %v2510_v42, %v144_v52  ;;  %v170_v7 = vsub.f32 %v2512_v43, %v169_v53  ;;  %v190_v8 = vand.u32 4294901760, %v2534_v54 }
  0x35   :  { %2026 = vmatprep.subr.bf16.mxu0 %v2413_v0  ;;  %2170 = vmatprep.subr.bf16.mxu1 %v2413_v0  ;;  %v2567_v9 = vsub.f32 %v60_v30, %v107_v41  ;;  %v157_v10 = vand.u32 4294901760, %v156_v56  ;;  %v164_v11 = vand.u32 4294901760, %v163_v57  ;;  %v177_v14 = vsub.f32 %v2519_v47, %v176_v58 }
  0x36   :  { %v197_v15 = vand.u32 4294901760, %v2536_v55  ;;  %v204_v16 = vand.u32 4294901760, %v2542_v59  ;;  %v211_v17 = vand.u32 4294901760, %v2547_v61  ;;  %v218_v19 = vand.u32 4294901760, %v2549_v62 }
  0x37   :  { %v225_v20 = vand.u32 4294901760, %v2551_v63  ;;  %v232_v21 = vand.u32 4294901760, %v2554_v2  ;;  %v239_v23 = vand.u32 4294901760, %v2556_v3  ;;  %v246_v24 = vand.u32 4294901760, %v2558_v4 }
  0x38   :  { %2028 = vmatpush3.bf16.msra.mxu0 %v2499_v32  ;;  %2172 = vmatpush3.bf16.msra.mxu1 %v2499_v32  ;;  %v253_v25 = vand.u32 4294901760, %v2560_v5  ;;  %v260_v26 = vand.u32 4294901760, %v2567_v9  ;;  %v2584_v27 = vpack.c.bf16 %v162_v46, %v155_v45  ;;  %v2586_v28 = vpack.c.bf16 %v176_v58, %v169_v53 }
  0x39   :  { %2029 = vmatprep.subr.bf16.mxu0 %v2413_v0  ;;  %2173 = vmatprep.subr.bf16.mxu1 %v2413_v0  ;;  %v2588_v29 = vpack.c.bf16 %v190_v8, %v183_v60  ;;  %v2591_v30 = vpack.c.bf16 %v204_v16, %v197_v15  ;;  %v2593_v33 = vpack.c.bf16 %v218_v19, %v211_v17  ;;  %v146_v39 = vand.u32 4294901760, %v145_v6 }
  0x3a   :  { %v2595_v36 = vpack.c.bf16 %v232_v21, %v225_v20  ;;  %v2597_v37 = vpack.c.bf16 %v246_v24, %v239_v23  ;;  %v2600_v38 = vpack.c.bf16 %v260_v26, %v253_v25  ;;  %v184_v40 = vsub.f32 %v2523_v48, %v183_v60 }
  0x3b   :  { %v2606_v41 = vpack.c.bf16 %v164_v11, %v157_v10  ;;  %v171_v45 = vand.u32 4294901760, %v170_v7  ;;  %v178_v46 = vand.u32 4294901760, %v177_v14  ;;  %v191_v53 = vsub.f32 %v2534_v54, %v190_v8 }
  0x3c   :  { %2031 = vmatpush3.bf16.msra.mxu0 %v2515_v44  ;;  %2175 = vmatpush3.bf16.msra.mxu1 %v2515_v44  ;;  %v198_v56 = vsub.f32 %v2536_v55, %v197_v15  ;;  %v185_v58 = vand.u32 4294901760, %v184_v40  ;;  %v205_v6 = vsub.f32 %v2542_v59, %v204_v16  ;;  %v212_v11 = vsub.f32 %v2547_v61, %v211_v17 }
  0x3d   :  { %2032 = vmatprep.subr.bf16.mxu0 %v2413_v0  ;;  %2176 = vmatprep.subr.bf16.mxu1 %v2413_v0  ;;  %v2614_v57 = vpack.c.bf16 %v178_v46, %v171_v45  ;;  %v192_v60 = vand.u32 4294901760, %v191_v53  ;;  %v219_v14 = vsub.f32 %v2549_v62, %v218_v19  ;;  %v226_v15 = vsub.f32 %v2551_v63, %v225_v20 }
  0x3e   :  { %v199_v7 = vand.u32 4294901760, %v198_v56  ;;  %v206_v10 = vand.u32 4294901760, %v205_v6  ;;  %v233_v45 = vsub.f32 %v2554_v2, %v232_v21  ;;  %v240_v46 = vsub.f32 %v2556_v3, %v239_v23 }
  0x3f   :  { %v2621_v8 = vpack.c.bf16 %v192_v60, %v185_v58  ;;  %v220_v40 = vand.u32 4294901760, %v219_v14  ;;  %v227_v19 = vand.u32 4294901760, %v226_v15  ;;  %v247_v20 = vsub.f32 %v2558_v4, %v246_v24 }
  0x40   :  { %2034 = vmatpush3.bf16.msra.mxu0 %v2526_v49  ;;  %2178 = vmatpush3.bf16.msra.mxu1 %v2526_v49  ;;  %v2628_v16 = vpack.c.bf16 %v206_v10, %v199_v7  ;;  %v234_v53 = vand.u32 4294901760, %v233_v45  ;;  %v254_v56 = vsub.f32 %v2560_v5, %v253_v25  ;;  %v241_v21 = vand.u32 4294901760, %v240_v46 }
  0x41   :  { %2035 = vmatprep.subr.bf16.mxu0 %v2413_v0  ;;  %2179 = vmatprep.subr.bf16.mxu1 %v2413_v0  ;;  %v248_v60 = vand.u32 4294901760, %v247_v20  ;;  %v261_v23 = vsub.f32 %v2567_v9, %v260_v26  ;;  %v2655_v26 = vpack.c.bf16 %v2503_v35, %v2501_v34  ;;  %v2662_v10 = vpack.c.bf16 %v2519_v47, %v2512_v43 }
  0x42   :  { %v2640_v58 = vpack.c.bf16 %v234_v53, %v227_v19  ;;  %v255_v7 = vand.u32 4294901760, %v254_v56  ;;  %v2670_v34 = vpack.c.bf16 %v2534_v54, %v2523_v48  ;;  %v2676_v35 = vpack.c.bf16 %v2542_v59, %v2536_v55 }
  0x43   :  { %v2645_v6 = vpack.c.bf16 %v248_v60, %v241_v21  ;;  %v262_v24 = vand.u32 4294901760, %v261_v23  ;;  %v2682_v43 = vpack.c.bf16 %v2549_v62, %v2547_v61  ;;  %v2688_v47 = vpack.c.bf16 %v2554_v2, %v2551_v63 }
  0x44   :  { %2037 = vmatpush3.bf16.msra.mxu0 %v2528_v50  ;;  %2181 = vmatpush3.bf16.msra.mxu1 %v2528_v50  ;;  %v2694_v48 = vpack.c.bf16 %v2558_v4, %v2556_v3  ;;  %v2700_v54 = vpack.c.bf16 %v2567_v9, %v2560_v5  ;;  %v1392_v9 = vld [vmem:[%s2885_s2] ss:$0 sm:$0xff] }
  0x45   :  { %2038 = vmatprep.subr.bf16.mxu0 %v2413_v0  ;;  %2182 = vmatprep.subr.bf16.mxu1 %v2413_v0  ;;  %v2649_v25 = vpack.c.bf16 %v262_v24, %v255_v7 }
  0x48   :  { %2040 = vmatpush3.bf16.msra.mxu0 %v2530_v51  ;;  %2184 = vmatpush3.bf16.msra.mxu1 %v2530_v51 }
  0x49   :  { %2041 = vmatprep.subr.bf16.mxu0 %v2413_v0  ;;  %2185 = vmatprep.subr.bf16.mxu1 %v2413_v0 }
  0x4b   :  { %1630 = vmatmul.mubr.f32.vlgmr.msra.gmra.mrb[0].mxu0 %v146_v39  ;;  %v213_v39 = vand.u32 4294901760, %v212_v11 }
  0x4c   :  { %2043 = vmatpush3.bf16.msra.mxu0 %v2606_v41  ;;  %1664 = vmatprep.mubr.msk.f32.mxu0 %vm2414_vm0, %v2415_v1 }
  0x4d   :  { %2044 = vmatprep.subr.bf16.mxu0 %v2413_v0  ;;  %v2634_v17 = vpack.c.bf16 %v220_v40, %v213_v39 }
  0x50   :  { %2046 = vmatpush3.bf16.msra.mxu0 %v2614_v57 }
  0x51   :  { %2047 = vmatprep.subr.bf16.mxu0 %v2413_v0 }
  0x54   :  { %2049 = vmatpush3.bf16.msra.mxu0 %v2621_v8 }
  0x55   :  { %2050 = vmatprep.subr.bf16.mxu0 %v2413_v0 }
  0x58   :  { %2052 = vmatpush3.bf16.msra.mxu0 %v2628_v16 }
  0x59   :  { %2053 = vmatprep.subr.bf16.mxu0 %v2413_v0 }
  0x5c   :  { %2055 = vmatpush3.bf16.msra.mxu0 %v2634_v17 }
  0x5d   :  { %2056 = vmatprep.subr.bf16.mxu0 %v2413_v0 }
  0x60   :  { %2058 = vmatpush3.bf16.msra.mxu0 %v2640_v58 }
  0x61   :  { %2059 = vmatprep.subr.bf16.mxu0 %v2413_v0 }
  0x64   :  { %2061 = vmatpush3.bf16.msra.mxu0 %v2645_v6 }
  0x65   :  { %2062 = vmatprep.subr.bf16.mxu0 %v2413_v0 }
  0x68   :  { %2064 = vmatpush3.bf16.msra.mxu0 %v2649_v25 }
  0x69   :  { %2065 = vmatprep.subr.bf16.mxu0 %v2413_v0 }
  0x6b   :  { %1665 = vmatmul.mubr.f32.vlgmr.msra.gmra.mrb[0].mxu0 %v2496_v31 }
  0x6c   :  { %2067 = vmatpush3.bf16.msra.mxu0 %v2655_v26  ;;  %1699 = vmatprep.mubr.msk.f32.mxu0 %vm2414_vm0, %v2415_v1 }
  0x6d   :  { %2068 = vmatprep.subr.bf16.mxu0 %v2413_v0 }
  0x70   :  { %2070 = vmatpush3.bf16.msra.mxu0 %v2662_v10 }
  0x71   :  { %2071 = vmatprep.subr.bf16.mxu0 %v2413_v0 }
  0x74   :  { %2073 = vmatpush3.bf16.msra.mxu0 %v2670_v34 }
  0x75   :  { %2074 = vmatprep.subr.bf16.mxu0 %v2413_v0 }
  0x78   :  { %2076 = vmatpush3.bf16.msra.mxu0 %v2676_v35 }
  0x79   :  { %2077 = vmatprep.subr.bf16.mxu0 %v2413_v0 }
  0x7c   :  { %2079 = vmatpush3.bf16.msra.mxu0 %v2682_v43 }
  0x7d   :  { %2080 = vmatprep.subr.bf16.mxu0 %v2413_v0 }
  0x80   :  { %2082 = vmatpush3.bf16.msra.mxu0 %v2688_v47 }
  0x81   :  { %2083 = vmatprep.subr.bf16.mxu0 %v2413_v0 }
  0x84   :  { %2085 = vmatpush3.bf16.msra.mxu0 %v2694_v48 }
  0x85   :  { %2086 = vmatprep.subr.bf16.mxu0 %v2413_v0 }
  0x88   :  { %2088 = vmatpush3.bf16.msra.mxu0 %v2700_v54 }
  0x89   :  { %2089 = vmatprep.subr.bf16.mxu0 %v2413_v0 }
  0x8b   :  { %1700 = vmatmul.mubr.f32.vlgmr.msra.gmra.mrb[0].mxu0 %v2510_v42 }
  0x8c   :  { %2091 = vmatpush3.bf16.msra.mxu0 %v2479_v12  ;;  %1734 = vmatprep.mubr.msk.f32.mxu0 %vm2414_vm0, %v2415_v1 }
  0x8d   :  { %2092 = vmatprep.subr.bf16.mxu0 %v2413_v0 }
  0x90   :  { %2094 = vmatpush3.bf16.msra.mxu0 %v2482_v13 }
  0x91   :  { %2095 = vmatprep.subr.bf16.mxu0 %v2413_v0 }
  0x94   :  { %2097 = vmatpush3.bf16.msra.mxu0 %v2488_v18 }
  0x95   :  { %2098 = vmatprep.subr.bf16.mxu0 %v2413_v0 }
  0x98   :  { %2100 = vmatpush3.bf16.msra.mxu0 %v2499_v32 }
  0x99   :  { %2101 = vmatprep.subr.bf16.mxu0 %v2413_v0 }
  0x9c   :  { %2103 = vmatpush3.bf16.msra.mxu0 %v2515_v44 }
  0x9d   :  { %2104 = vmatprep.subr.bf16.mxu0 %v2413_v0 }
  0xa0   :  { %2106 = vmatpush3.bf16.msra.mxu0 %v2526_v49 }
  0xa1   :  { %2107 = vmatprep.subr.bf16.mxu0 %v2413_v0 }
  0xa4   :  { %2109 = vmatpush3.bf16.msra.mxu0 %v2528_v50 }
  0xa5   :  { %2110 = vmatprep.subr.bf16.mxu0 %v2413_v0 }
  0xa8   :  { %2112 = vmatpush3.bf16.msra.mxu0 %v2530_v51 }
  0xa9   :  { %2113 = vmatprep.subr.bf16.mxu0 %v2413_v0 }
  0xab   :  { %1735 = vmatmul.mubr.f32.vlgmr.msra.gmra.mrb[0].mxu0 %v144_v52 }
  0xac   :  { %2115 = vmatpush3.bf16.msra.mxu0 %v2584_v27  ;;  %1769 = vmatprep.mubr.msk.f32.mxu0 %vm2414_vm0, %v2415_v1 }
  0xad   :  { %2116 = vmatprep.subr.bf16.mxu0 %v2413_v0 }
  0xb0   :  { %2118 = vmatpush3.bf16.msra.mxu0 %v2586_v28 }
  0xb1   :  { %2119 = vmatprep.subr.bf16.mxu0 %v2413_v0 }
  0xb4   :  { %2121 = vmatpush3.bf16.msra.mxu0 %v2588_v29 }
  0xb5   :  { %2122 = vmatprep.subr.bf16.mxu0 %v2413_v0 }
  0xb8   :  { %2124 = vmatpush3.bf16.msra.mxu0 %v2591_v30 }
  0xb9   :  { %2125 = vmatprep.subr.bf16.mxu0 %v2413_v0 }
  0xbc   :  { %2127 = vmatpush3.bf16.msra.mxu0 %v2593_v33 }
  0xbd   :  { %2128 = vmatprep.subr.bf16.mxu0 %v2413_v0 }
  0xc0   :  { %2130 = vmatpush3.bf16.msra.mxu0 %v2595_v36 }
  0xc1   :  { %2131 = vmatprep.subr.bf16.mxu0 %v2413_v0 }
  0xc4   :  { %2133 = vmatpush3.bf16.msra.mxu0 %v2597_v37 }
  0xc5   :  { %2134 = vmatprep.subr.bf16.mxu0 %v2413_v0 }
  0xc8   :  { %2136 = vmatpush3.bf16.msra.mxu0 %v2600_v38 }
  0xc9   :  { %2137 = vmatprep.subr.bf16.mxu0 %v2413_v0 }
  0xcb   :  { %1770 = vmatmul.mubr.f32.vlgmr.msra.gmra.mrb[0].mxu0 %v2496_v31 }
  0xcc   :  { %2139 = vmatpush3.bf16.msra.mxu0 %v2479_v12  ;;  %1804 = vmatprep.mubr.msk.f32.mxu0 %vm2414_vm0, %v2415_v1 }
  0xcd   :  { %2140 = vmatprep.subr.bf16.mxu0 %v2413_v0 }
  0xd0   :  { %2142 = vmatpush3.bf16.msra.mxu0 %v2482_v13 }
  0xd1   :  { %2143 = vmatprep.subr.bf16.mxu0 %v2413_v0 }
  0xd4   :  { %2145 = vmatpush3.bf16.msra.mxu0 %v2488_v18 }
  0xd5   :  { %2146 = vmatprep.subr.bf16.mxu0 %v2413_v0 }
  0xd8   :  { %2148 = vmatpush3.bf16.msra.mxu0 %v2499_v32 }
  0xd9   :  { %2149 = vmatprep.subr.bf16.mxu0 %v2413_v0 }
  0xdc   :  { %2151 = vmatpush3.bf16.msra.mxu0 %v2515_v44 }
  0xdd   :  { %2152 = vmatprep.subr.bf16.mxu0 %v2413_v0 }
  0xe0   :  { %2154 = vmatpush3.bf16.msra.mxu0 %v2526_v49 }
  0xe1   :  { %2155 = vmatprep.subr.bf16.mxu0 %v2413_v0 }
  0xe4   :  { %2157 = vmatpush3.bf16.msra.mxu0 %v2528_v50 }
  0xe5   :  { %2158 = vmatprep.subr.bf16.mxu0 %v2413_v0 }
  0xe8   :  { %2160 = vmatpush3.bf16.msra.mxu0 %v2530_v51 }
  0xeb   :  { %1805 = vmatmul.mubr.f32.vlgmr.msra.gmra.mrb[0].mxu0 %v2496_v31 }
 0x1be   :  { %v698_v42 = vpop.f32.mrb[0].mxu0 }
 0x1bf   :  { %v702_v52 = vmul.f32 0.03125, %v698_v42  ;;  %v1806_v55 = vpop.f32.mrb[1].mxu0 }
 0x1c1   :  { %v2764_v59 = vsub.f32 %v2490_v22, %v702_v52 }
 0x1c3   :  { %v704_v61 = vmul.f32 %v2764_v59, %v2764_v59 }
 0x1c5   :  { %v2768_v62 = vand.u32 4294901760, %v704_v61 }
 0x1c7   :  { %v787_v63 = vsub.f32 %v704_v61, %v2768_v62 }
 0x1c9   :  { %v788_v2 = vand.u32 4294901760, %v787_v63 }
 0x1cb   :  { %v789_v3 = vsub.f32 %v787_v63, %v788_v2 }
 0x1cd   :  { %v790_v4 = vand.u32 4294901760, %v789_v3 }
 0x1cf   :  { %1840 = vmatmul.mubr.f32.vlgmr.msra.gmra.mrb[0].mxu1 %v790_v4 }
 0x1d0   :  { %2187 = vmatpush3.bf16.msra.mxu1 %v2606_v41  ;;  %1874 = vmatprep.mubr.msk.f32.mxu1 %vm2414_vm0, %v2415_v1 }
 0x1d1   :  { %2188 = vmatprep.subr.bf16.mxu1 %v2413_v0 }
 0x1d4   :  { %2190 = vmatpush3.bf16.msra.mxu1 %v2614_v57 }
 0x1d5   :  { %2191 = vmatprep.subr.bf16.mxu1 %v2413_v0 }
 0x1d8   :  { %2193 = vmatpush3.bf16.msra.mxu1 %v2621_v8 }
 0x1d9   :  { %2194 = vmatprep.subr.bf16.mxu1 %v2413_v0 }
 0x1dc   :  { %2196 = vmatpush3.bf16.msra.mxu1 %v2628_v16 }
 0x1dd   :  { %2197 = vmatprep.subr.bf16.mxu1 %v2413_v0 }
 0x1e0   :  { %2199 = vmatpush3.bf16.msra.mxu1 %v2634_v17 }
 0x1e1   :  { %2200 = vmatprep.subr.bf16.mxu1 %v2413_v0 }
 0x1e4   :  { %2202 = vmatpush3.bf16.msra.mxu1 %v2640_v58 }
 0x1e5   :  { %2203 = vmatprep.subr.bf16.mxu1 %v2413_v0 }
 0x1e8   :  { %2205 = vmatpush3.bf16.msra.mxu1 %v2645_v6 }
 0x1e9   :  { %2206 = vmatprep.subr.bf16.mxu1 %v2413_v0 }
 0x1ec   :  { %2208 = vmatpush3.bf16.msra.mxu1 %v2649_v25 }
 0x1ed   :  { %2209 = vmatprep.subr.bf16.mxu1 %v2413_v0 }
 0x1ef   :  { %1875 = vmatmul.mubr.f32.vlgmr.msra.gmra.mrb[0].mxu1 %v2768_v62 }
 0x1f0   :  { %2211 = vmatpush3.bf16.msra.mxu1 %v2655_v26  ;;  %1909 = vmatprep.mubr.msk.f32.mxu1 %vm2414_vm0, %v2415_v1 }
 0x1f1   :  { %2212 = vmatprep.subr.bf16.mxu1 %v2413_v0 }
 0x1f4   :  { %2214 = vmatpush3.bf16.msra.mxu1 %v2662_v10 }
 0x1f5   :  { %2215 = vmatprep.subr.bf16.mxu1 %v2413_v0 }
 0x1f8   :  { %2217 = vmatpush3.bf16.msra.mxu1 %v2670_v34 }
 0x1f9   :  { %2218 = vmatprep.subr.bf16.mxu1 %v2413_v0 }
 0x1fc   :  { %2220 = vmatpush3.bf16.msra.mxu1 %v2676_v35 }
 0x1fd   :  { %2221 = vmatprep.subr.bf16.mxu1 %v2413_v0 }
 0x200   :  { %2223 = vmatpush3.bf16.msra.mxu1 %v2682_v43 }
 0x201   :  { %2224 = vmatprep.subr.bf16.mxu1 %v2413_v0 }
 0x204   :  { %2226 = vmatpush3.bf16.msra.mxu1 %v2688_v47 }
 0x205   :  { %2227 = vmatprep.subr.bf16.mxu1 %v2413_v0 }
 0x208   :  { %2229 = vmatpush3.bf16.msra.mxu1 %v2694_v48 }
 0x209   :  { %2230 = vmatprep.subr.bf16.mxu1 %v2413_v0 }
 0x20c   :  { %2232 = vmatpush3.bf16.msra.mxu1 %v2700_v54 }
 0x20d   :  { %2233 = vmatprep.subr.bf16.mxu1 %v2413_v0 }
 0x20f   :  { %1910 = vmatmul.mubr.f32.vlgmr.msra.gmra.mrb[0].mxu1 %v787_v63 }
 0x210   :  { %2235 = vmatpush3.bf16.msra.mxu1 %v2479_v12  ;;  %1944 = vmatprep.mubr.msk.f32.mxu1 %vm2414_vm0, %v2415_v1 }
 0x211   :  { %2236 = vmatprep.subr.bf16.mxu1 %v2413_v0 }
 0x214   :  { %2238 = vmatpush3.bf16.msra.mxu1 %v2482_v13 }
 0x215   :  { %2239 = vmatprep.subr.bf16.mxu1 %v2413_v0 }
 0x218   :  { %2241 = vmatpush3.bf16.msra.mxu1 %v2488_v18 }
 0x219   :  { %2242 = vmatprep.subr.bf16.mxu1 %v2413_v0 }
 0x21c   :  { %2244 = vmatpush3.bf16.msra.mxu1 %v2499_v32 }
 0x21d   :  { %2245 = vmatprep.subr.bf16.mxu1 %v2413_v0 }
 0x220   :  { %2247 = vmatpush3.bf16.msra.mxu1 %v2515_v44 }
 0x221   :  { %2248 = vmatprep.subr.bf16.mxu1 %v2413_v0 }
 0x224   :  { %2250 = vmatpush3.bf16.msra.mxu1 %v2526_v49 }
 0x225   :  { %2251 = vmatprep.subr.bf16.mxu1 %v2413_v0 }
 0x228   :  { %2253 = vmatpush3.bf16.msra.mxu1 %v2528_v50 }
 0x229   :  { %2254 = vmatprep.subr.bf16.mxu1 %v2413_v0 }
 0x22c   :  { %2256 = vmatpush3.bf16.msra.mxu1 %v2530_v51 }
 0x22d   :  { %2257 = vmatprep.subr.bf16.mxu1 %v2413_v0 }
 0x22f   :  { %1945 = vmatmul.mubr.f32.vlgmr.msra.gmra.mrb[0].mxu1 %v788_v2 }
 0x230   :  { %2259 = vmatpush3.bf16.msra.mxu1 %v2584_v27  ;;  %1979 = vmatprep.mubr.msk.f32.mxu1 %vm2414_vm0, %v2415_v1 }
 0x231   :  { %2260 = vmatprep.subr.bf16.mxu1 %v2413_v0 }
 0x234   :  { %2262 = vmatpush3.bf16.msra.mxu1 %v2586_v28 }
 0x235   :  { %2263 = vmatprep.subr.bf16.mxu1 %v2413_v0 }
 0x238   :  { %2265 = vmatpush3.bf16.msra.mxu1 %v2588_v29 }
 0x239   :  { %2266 = vmatprep.subr.bf16.mxu1 %v2413_v0 }
 0x23c   :  { %2268 = vmatpush3.bf16.msra.mxu1 %v2591_v30 }
 0x23d   :  { %2269 = vmatprep.subr.bf16.mxu1 %v2413_v0 }
 0x240   :  { %2271 = vmatpush3.bf16.msra.mxu1 %v2593_v33 }
 0x241   :  { %2272 = vmatprep.subr.bf16.mxu1 %v2413_v0 }
 0x244   :  { %2274 = vmatpush3.bf16.msra.mxu1 %v2595_v36 }
 0x245   :  { %2275 = vmatprep.subr.bf16.mxu1 %v2413_v0 }
 0x248   :  { %2277 = vmatpush3.bf16.msra.mxu1 %v2597_v37 }
 0x249   :  { %2278 = vmatprep.subr.bf16.mxu1 %v2413_v0 }
 0x24c   :  { %2280 = vmatpush3.bf16.msra.mxu1 %v2600_v38 }
 0x24d   :  { %2281 = vmatprep.subr.bf16.mxu1 %v2413_v0 }
 0x24f   :  { %1980 = vmatmul.mubr.f32.vlgmr.msra.gmra.mrb[0].mxu1 %v2768_v62 }
 0x250   :  { %2283 = vmatpush3.bf16.msra.mxu1 %v2479_v12  ;;  %2014 = vmatprep.mubr.msk.f32.mxu1 %vm2414_vm0, %v2415_v1 }
 0x251   :  { %2284 = vmatprep.subr.bf16.mxu1 %v2413_v0 }
 0x254   :  { %2286 = vmatpush3.bf16.msra.mxu1 %v2482_v13 }
 0x255   :  { %2287 = vmatprep.subr.bf16.mxu1 %v2413_v0 }
 0x258   :  { %2289 = vmatpush3.bf16.msra.mxu1 %v2488_v18 }
 0x259   :  { %2290 = vmatprep.subr.bf16.mxu1 %v2413_v0 }
 0x25c   :  { %2292 = vmatpush3.bf16.msra.mxu1 %v2499_v32 }
 0x25d   :  { %2293 = vmatprep.subr.bf16.mxu1 %v2413_v0 }
 0x260   :  { %2295 = vmatpush3.bf16.msra.mxu1 %v2515_v44 }
 0x261   :  { %2296 = vmatprep.subr.bf16.mxu1 %v2413_v0 }
 0x264   :  { %2298 = vmatpush3.bf16.msra.mxu1 %v2526_v49 }
 0x265   :  { %2299 = vmatprep.subr.bf16.mxu1 %v2413_v0 }
 0x268   :  { %2301 = vmatpush3.bf16.msra.mxu1 %v2528_v50 }
 0x269   :  { %2302 = vmatprep.subr.bf16.mxu1 %v2413_v0  ;;  %v1391_v0 = vld [vmem:[%s2884_s1] ss:$0 sm:$0xff] }
 0x26c   :  { %2304 = vmatpush3.bf16.msra.mxu1 %v2530_v51 }
 0x26f   :  { %2015 = vmatmul.mubr.f32.vlgmr.msra.gmra.mrb[0].mxu1 %v2768_v62 }
 0x342   :  { %v1342_v1 = vpop.f32.mrb[0].mxu1 }
 0x343   :  { %v1346_v12 = vmul.f32 0.032258064, %v1342_v1  ;;  %v2016_v13 = vpop.f32.mrb[1].mxu1 }
 0x345   :  { %2333 = vrsqrt.f32 %v1346_v12  ;;  %vm1349_vm1 = vcmp.eq.f32.partialorder %v1346_v12, inf  ;;  %v1352_v32 = vand.u32 2147483648, %v1346_v12  ;;  %vm1351_vm2 = vcmp.eq.f32.partialorder %v1346_v12, 0.0 }
 0x34f   :  { %v2334_v18 = vpop.eup %2333 }
 0x350   :  { %v1348_v31 = vmul.f32 %v2334_v18, %v1346_v12 }
 0x352   :  { %v1350_v44 = vsel %vm1349_vm1, %v1346_v12, %v1348_v31 }
 0x353   :  { %v1353_v49 = vsel %vm1351_vm2, %v1352_v32, %v1350_v44 }
 0x354   :  { %v1354_v5 = vadd.f32 1e-06, %v1353_v49 }
 0x356   :  { %2335 = vrcp.f32 %v1354_v5 }
 0x360   :  { %v2336_v50 = vpop.eup %2335 }
 0x361   :  { %v1364_v51 = vmul.f32 %v2336_v50, %v1391_v0 }
 0x363   :  { %v1365_v27 = vmul.f32 %v1364_v51, %v2764_v59 }
 0x365   :  { %v1372_v28 = vadd.f32 %v1392_v9, %v1365_v27 }
 0x367   :  { %v1373_v29 = vadd.f32 %v1372_v28, %v2490_v22 }
 0x369   :  { %1374 = vst [vmem:[#allocation7] sm:$0xff] %v1373_v29 }
 0x36a   :  { %2392 = shalt.err (!%p2389_p6)
}
 0x36b   :  { %s2393_s2 = scalar_lea.hbm %s2887_s4, 128 }
 0x36c   :  { %p2394_p7 = scmp.ne.s32.totalorder %s2887_s4, %s2393_s2  ;;  %p2397_p8 = scmp.lt.u32.totalorder %s2393_s2, %s2887_s4 }
 0x36e   :  { %p2399_p9 = pnand %p2397_p8, %p2394_p7 }
 0x370   :  { %2402 = shalt.err (!%p2399_p9)
}
 0x371   :  { %1384 = dma.vmem_to_hbm [thread:$0]  %s1382_s18, 128, %s2887_s4, [#allocation4]  }
 0x372   :  { %2407 = dma.done.wait [#allocation4], 128  }
 0x373   :  { %2408 = vsyncadd [#allocation4], 4294967168 }
 0x374   :  { %1388 = vsyncpa [#allocation3], 1 }
 0x375   :  { %1389 = vsyncpa [#allocation6], 1 }
 0x376   :  { %1390 = vsyncpa [#allocation4], 1 }

</bundles_post_ra>
